<compile_context>
chip_gen: v5e
topology: v5e:2x2
jax: 0.10.0
libtpu: 0.0.40
codegen_flags: <defaults>
</compile_context>

<pallas_src>
import jax
import jax.numpy as jnp
from jax import lax
from jax.experimental import pallas as pl
from jax.experimental.pallas import tpu as pltpu

_LANES = 128
_MAX_TILE_ROWS = 2048            # (2048, 128) f32 block = 1 MiB
_CORE_SPLITS = 2                 # v7x: 2 TensorCores; harmless outer loop on v5e/v6e
_MIN_PALLAS_ELEMENTS = 64 * 1024 # below this a fused XLA reduce wins


def _make_sum_kernel(tile_rows):
    """Builds the reduction kernel for a static tile_rows."""

    def _sum_kernel(nrows_ref, x_ref, o_ref, acc_ref):
        c = pl.program_id(0)      # core-split index (parallel)
        k = pl.program_id(1)      # reduction step within this core (arbitrary)
        nk = pl.num_programs(1)

        @pl.when(k == 0)
        def _():
            acc_ref[...] = jnp.zeros_like(acc_ref)

        # Mask rows that lie past the end of the (unpadded) input.  Garbage in
        # the boundary / over-assigned blocks is zeroed before accumulation.
        blk = c * nk + k
        row0 = blk * tile_rows
        row_ids = row0 + lax.broadcasted_iota(jnp.int32, (tile_rows, 1), 0)
        x = jnp.where(row_ids < nrows_ref[0], x_ref[...].astype(jnp.float32), 0.0)

        # Fold (tile_rows, 128) onto the single-vreg (8, 128) accumulator with
        # element-wise adds only (VPU; no XLU, no tile-sized scratch RMW).
        full = (tile_rows // 8) * 8
        if full:
            acc_ref[...] += x[:full].reshape(full // 8, 8, _LANES).sum(axis=0)
        rem = tile_rows - full
        if rem:  # only for tiny forced inputs where tile_rows == rows < pack
            acc_ref[0:rem, :] += x[full:, :]

        # One (8, 128) partial writeback per core, exactly once, at the end.
        @pl.when(k == nk - 1)
        def _():
            o_ref[...] = acc_ref[...]

    return _sum_kernel


def width_sum(widths, *, min_pallas_elements=_MIN_PALLAS_ELEMENTS):
    """Global sum of `widths` (any shape / dtype), accumulated in float32."""
    n = widths.size
    if n == 0:
        return jnp.float32(0.0)

    x = widths.reshape(-1)                  # zero-copy for contiguous inputs
    rows = n // _LANES                      # full 128-lane rows
    tail = n - rows * _LANES

    if n < min_pallas_elements or rows == 0:
        # Realistic loss-sized inputs (O(100) widths): one fused XLA reduce
        # beats a pallas_call launch by orders of magnitude.
        return jnp.sum(x, dtype=jnp.float32)

    # Sub-32-bit dtypes pack along sublanes -> keep tile_rows a pack multiple.
    pack = max(1, 4 // widths.dtype.itemsize) * 8
    if rows < pack:
        tile_rows = rows                    # full-dim block (allowed by BlockSpec)
    else:
        tile_rows = min(_MAX_TILE_ROWS, (rows // pack) * pack)

    nblocks = -(-rows // tile_rows)
    bpc = -(-nblocks // _CORE_SPLITS)       # blocks per core-split

    if tail == 0:
        x2 = x.reshape(rows, _LANES)        # pure bitcast view, no HBM copy
    else:
        # TODO(synk): this bulk slice still copies rows*128 elements when
        # n % 128 != 0; avoiding it would need a 1-D HBM ref + manual DMA.
        x2 = x[: rows * _LANES].reshape(rows, _LANES)

    nrows = jnp.array([rows], dtype=jnp.int32)   # scalar-prefetched valid-row count

    def x_index_map(c, k, nrows_ref):
        # Core-splits may be assigned block indices past the end; clamp them.
        # Those blocks are fully masked in-kernel, so re-reading the last real
        # block is harmless.
        return (jnp.minimum(c * bpc + k, nblocks - 1), 0)

    partials = pl.pallas_call(
        _make_sum_kernel(tile_rows),
        out_shape=jax.ShapeDtypeStruct((_CORE_SPLITS, 8, _LANES), jnp.float32),
        grid_spec=pltpu.PrefetchScalarGridSpec(
            num_scalar_prefetch=1,
            grid=(_CORE_SPLITS, bpc),
            in_specs=[pl.BlockSpec((tile_rows, _LANES), x_index_map)],
            out_specs=pl.BlockSpec((None, 8, _LANES),
                                   lambda c, k, nrows_ref: (c, 0, 0)),
            scratch_shapes=[pltpu.VMEM((8, _LANES), jnp.float32)],
        ),
        compiler_params=pltpu.CompilerParams(
            dimension_semantics=("parallel", "arbitrary"),
        ),
    )(nrows, x2)

    total = jnp.sum(partials)               # 2x8x128 partials -> scalar (tiny)
    if tail:
        total = total + jnp.sum(x[rows * _LANES:], dtype=jnp.float32)
    return total


def width_loss_forward(widths, strokes_in_canvas_count,
                       width_loss_type="L1", width_loss_weight=1.0,
                       *, min_pallas_elements=_MIN_PALLAS_ELEMENTS):
    """Mirrors WidthLoss.forward."""
    sum_w = width_sum(widths, min_pallas_elements=min_pallas_elements)
    if width_loss_type == "L1_hinge":
        # torch.max(self.zero, sum_w - self.width_loss_weight)
        return jnp.maximum(jnp.float32(0.0), sum_w - width_loss_weight)
    return sum_w / strokes_in_canvas_count


if __name__ == "__main__":
    key = jax.random.PRNGKey(0)
    k1, k2 = jax.random.split(key)

    # Realistic loss-sized input: per-stroke widths for 2 canvases x 64 strokes.
    widths = jax.random.uniform(k1, (2, 64), dtype=jnp.float32)
    strokes_in_canvas_count = jnp.float32(64.0)
    width_loss_weight = 10.0

    # Default dispatcher (tiny input -> fused jnp.sum fast path).
    loss_mean = width_loss_forward(widths, strokes_in_canvas_count,
                                   width_loss_type="L1",
                                   width_loss_weight=width_loss_weight)
    loss_hinge = width_loss_forward(widths, strokes_in_canvas_count,
                                    width_loss_type="L1_hinge",
                                    width_loss_weight=width_loss_weight)

    # Force the Pallas path so the kernel itself is exercised:
    #   (2, 64)  -> 128 elems: single full 128-lane row
    #   (5, 999) -> 4995 elems: partial last block (row masking) + sub-128 tail
    sum_small_pallas = width_sum(widths, min_pallas_elements=0)
    widths_odd = jax.random.uniform(k2, (5, 999), dtype=jnp.float32)
    sum_odd_pallas = width_sum(widths_odd, min_pallas_elements=0)
    loss_hinge_pallas = width_loss_forward(widths_odd, jnp.float32(37.0),
                                           width_loss_type="L1_hinge",
                                           width_loss_weight=width_loss_weight,
                                           min_pallas_elements=0)

    (loss_mean, loss_hinge, sum_small_pallas, sum_odd_pallas,
     loss_hinge_pallas) = jax.block_until_ready(
        (loss_mean, loss_hinge, sum_small_pallas, sum_odd_pallas,
         loss_hinge_pallas))

    # pure-JAX references
    ref_sum_small = jnp.sum(widths, dtype=jnp.float32)
    ref_sum_odd = jnp.sum(widths_odd, dtype=jnp.float32)
    ref_mean = ref_sum_small / strokes_in_canvas_count
    ref_hinge = jnp.maximum(0.0, ref_sum_small - width_loss_weight)
    ref_hinge_odd = jnp.maximum(0.0, ref_sum_odd - width_loss_weight)

    assert jnp.allclose(loss_mean, ref_mean, rtol=1e-5, atol=1e-5), (loss_mean, ref_mean)
    assert jnp.allclose(loss_hinge, ref_hinge, rtol=1e-5, atol=1e-5), (loss_hinge, ref_hinge)
    assert jnp.allclose(sum_small_pallas, ref_sum_small, rtol=1e-5, atol=1e-5), (
        sum_small_pallas, ref_sum_small)
    assert jnp.allclose(sum_odd_pallas, ref_sum_odd, rtol=1e-4, atol=1e-4), (
        sum_odd_pallas, ref_sum_odd)
    assert jnp.allclose(loss_hinge_pallas, ref_hinge_odd, rtol=1e-4, atol=1e-4), (
        loss_hinge_pallas, ref_hinge_odd)

    print("KERNEL_OK")
</pallas_src>

<mosaic_0001>
module attributes {stable_mosaic.version = 11 : i64} {
  func.func @_sum_kernel(%arg0: i32, %arg1: i32, %arg2: memref<1xi32, #tpu.memory_space<smem>>, %arg3: memref<1x128xf32, #tpu.memory_space<vmem>>, %arg4: memref<1x8x128xf32, #tpu.memory_space<vmem>>, %arg5: memref<8x128xf32, #tpu.memory_space<vmem>>) attributes {dimension_semantics = [#tpu.dimension_semantics<parallel>, #tpu.dimension_semantics<arbitrary>], iteration_bounds = array<i64: 2, 1>, scalar_prefetch = 1 : i64, scratch_operands = 1 : i64, tpu.core_type = #tpu.core_type<tc>, window_params = [{transform_indices = @transform_0, window_bounds = array<i64: 1, 128>}, {transform_indices = @transform_1, window_bounds = array<i64: 1, 8, 128>}]} {
    %c0_i32 = arith.constant 0 : i32
    %0 = arith.cmpi eq, %arg1, %c0_i32 : i32
    %1 = arith.extui %0 : i1 to i32
    %c0_i32_0 = arith.constant 0 : i32
    %2 = arith.cmpi ne, %1, %c0_i32_0 : i32
    scf.if %2 {
      %cst_10 = arith.constant 0.000000e+00 : f32
      %23 = vector.broadcast %cst_10 : f32 to vector<8x128xf32>
      %c0_11 = arith.constant 0 : index
      %c0_12 = arith.constant 0 : index
      %24 = vector.load %arg5[%c0_11, %c0_12] : memref<8x128xf32, #tpu.memory_space<vmem>>, vector<8x128xf32>
      tpu.vector_store %arg5[%c0_11, %c0_12], %23 {strides = array<i32>} : memref<8x128xf32, #tpu.memory_space<vmem>>, vector<8x128xf32>,
    } else {
    }
    %c1_i32 = arith.constant 1 : i32
    %3 = arith.muli %arg0, %c1_i32 : i32
    %4 = arith.addi %3, %arg1 : i32
    %c1_i32_1 = arith.constant 1 : i32
    %5 = arith.muli %4, %c1_i32_1 : i32
    %6 = tpu.iota {dimensions = array<i32: 0>} : vector<1x1xi32>
    %7 = vector.broadcast %5 : i32 to vector<1x1xi32>
    %8 = arith.addi %7, %6 : vector<1x1xi32>
    %c0 = arith.constant 0 : index
    %9 = memref.load %arg2[%c0] : memref<1xi32, #tpu.memory_space<smem>>
    %10 = vector.broadcast %9 : i32 to vector<1x1xi32>
    %11 = arith.cmpi slt, %8, %10 : vector<1x1xi32>
    %c0_2 = arith.constant 0 : index
    %c0_3 = arith.constant 0 : index
    %12 = vector.load %arg3[%c0_2, %c0_3] : memref<1x128xf32, #tpu.memory_space<vmem>>, vector<1x128xf32>
    %cst = arith.constant 0.000000e+00 : f32
    %13 = vector.shape_cast %11 : vector<1x1xi1> to vector<1x1xi1>
    %14 = vector.broadcast %13 : vector<1x1xi1> to vector<1x128xi1>
    %15 = vector.broadcast %cst : f32 to vector<1x128xf32>
    %16 = arith.select %14, %12, %15 : vector<1x128xi1>, vector<1x128xf32>
    %c0_4 = arith.constant 0 : index
    %c0_5 = arith.constant 0 : index
    %17 = vector.load %arg5[%c0_4, %c0_5] : memref<8x128xf32, #tpu.memory_space<vmem>>, vector<1x128xf32>
    %18 = arith.addf %17, %16 : vector<1x128xf32>
    %c0_6 = arith.constant 0 : index
    %c0_7 = arith.constant 0 : index
    %19 = vector.load %arg5[%c0_6, %c0_7] : memref<8x128xf32, #tpu.memory_space<vmem>>, vector<1x128xf32>
    tpu.vector_store %arg5[%c0_6, %c0_7], %18 {strides = array<i32>} : memref<8x128xf32, #tpu.memory_space<vmem>>, vector<1x128xf32>,
    %c0_i32_8 = arith.constant 0 : i32
    %20 = arith.cmpi eq, %arg1, %c0_i32_8 : i32
    %21 = arith.extui %20 : i1 to i32
    %c0_i32_9 = arith.constant 0 : i32
    %22 = arith.cmpi ne, %21, %c0_i32_9 : i32
    scf.if %22 {
      %c0_10 = arith.constant 0 : index
      %c0_11 = arith.constant 0 : index
      %23 = vector.load %arg5[%c0_10, %c0_11] : memref<8x128xf32, #tpu.memory_space<vmem>>, vector<8x128xf32>
      %c0_12 = arith.constant 0 : index
      %c0_13 = arith.constant 0 : index
      %c0_14 = arith.constant 0 : index
      %24 = vector.load %arg4[%c0_12, %c0_13, %c0_14] : memref<1x8x128xf32, #tpu.memory_space<vmem>>, vector<1x8x128xf32>
      %25 = vector.shape_cast %24 : vector<1x8x128xf32> to vector<8x128xf32>
      %26 = vector.shape_cast %23 : vector<8x128xf32> to vector<1x8x128xf32>
      tpu.vector_store %arg4[%c0_12, %c0_13, %c0_14], %26 {strides = array<i32>} : memref<1x8x128xf32, #tpu.memory_space<vmem>>, vector<1x8x128xf32>,
    } else {
    }
    return
  }
  func.func @transform_0(%arg0: i32, %arg1: i32, %arg2: memref<1xi32, #tpu.memory_space<smem>>) -> (i32, i32) {
    %c1_i32 = arith.constant 1 : i32
    %0 = arith.muli %arg0, %c1_i32 : i32
    %1 = arith.addi %0, %arg1 : i32
    %c0_i32 = arith.constant 0 : i32
    %2 = arith.minsi %1, %c0_i32 : i32
    %c0_i32_0 = arith.constant 0 : i32
    %c0_i32_1 = arith.constant 0 : i32
    return %2, %c0_i32_0 : i32, i32
  }
  func.func @transform_1(%arg0: i32, %arg1: i32, %arg2: memref<1xi32, #tpu.memory_space<smem>>) -> (i32, i32, i32) {
    %c0_i32 = arith.constant 0 : i32
    %c0_i32_0 = arith.constant 0 : i32
    %c0_i32_1 = arith.constant 0 : i32
    return %arg0, %c0_i32, %c0_i32_0 : i32, i32, i32
  }
}

</mosaic_0001>

<bundles_post_ra>
// kernel: tpu_custom_call.1
= control target key start
LH: loop header
LB: loop body
LE: loop exit
PB: predicated region body
PF: predicated region fallthrough
CT: control target
= control target key end

     0   :  { %s515_s0 = inlined_call_operand.<no memory space> [shape: s32[1], index: 0, kind: input, shape index: {}]   ;;  %s516_s1 = inlined_call_operand.vmem [shape: f32[1,128], index: 1, kind: input, shape index: {}]   ;;  %s517_s2 = inlined_call_operand.hbm [shape: f32[2,8,128], index: 2, kind: output, shape index: {}]  }
   0x1   :  { %7 = sst [smem:[#allocation4]] %s515_s0 }
   0x2   :  { %8 = vsyncpa [#allocation6], 0 }
   0x3   :  { %10 = vsyncpa [#allocation6 + $0x1], 0  ;;  %s417_s11 = smov 0   ;;  %s419_s12 = smov 0  }
   0x4   :  { %s421_s13 = smov 0   ;;  %s423_s14 = smov 0  }
   0x5   :  { %s425_s15 = smov 0   ;;  %s427_s16 = smov 0  }
   0x6 LB: > { %s249_s0 = sadd.s32 4294967295, %s396_s16   ;;  %s250_s17 = sadd.s32 4294967294, %s396_s16   ;;  %s396_s16 = sphi %s427_s16, %s16_s16   ;;  %s392_s15 = sphi %s425_s15, %s524_s15   ;;  %s388_s14 = sphi %s423_s14, %s523_s14   ;;  %s384_s13 = sphi %s421_s13, %s522_s13   ;;  %s380_s12 = sphi %s419_s12, %s521_s12   ;;  %s376_s11 = sphi %s417_s11, %s520_s11  }
   0x7   : > { %s28_s18 = sadd.s32 1, %s392_s15  ;;  %s67_s19 = sadd.s32 1, %s384_s13 }
   0x8   : > { %p30_p0 = scmp.ge.s32.totalorder %s28_s18, 2  ;;  %p77_p1 = scmp.ne.s32.totalorder %s384_s13, %s380_s12 }
   0x9   : > { %p78_p2 = scmp.eq.s32.totalorder %s249_s0, 1  ;;  %p83_p3 = scmp.ne.s32.totalorder %s380_s12, %s376_s11 }
   0xa   : > { %s526_s18 = smov (%p30_p0, %s28_s18), 0  ;;  %p84_p5 = scmp.eq.s32.totalorder %s250_s17, 1 }
   0xb   : > { %p457_p4 = por %p78_p2, %p77_p1  ;;  %s64_s21 = ssub.s32 %s392_s15, %s526_s18 }
   0xc   : > { %p253_p6 = scmp.ge.s32.totalorder %s396_s16, 1  ;;  %p65_p7 = scmp.eq.s32.totalorder %s64_s21, 0 }
   0xd   : > { %p464_p8 = por %p84_p5, %p83_p3  ;;  %p114_p9 = scmp.lt.s32.totalorder %s396_s16, 3 }
   0xe   : > { %s470_s23 = scalar_select %p65_p7, %s384_s13, %s67_s19  }
   0xf   : > { %p115_p10 = pnand %p253_p6, %p114_p9 }
  0x10   : > { %p136_p11 = scmp.lt.s32.totalorder (!%p115_p10), %s388_s14, 0  ;;  %s154_s24 = sld [smem:[#allocation4]] (!%p115_p10) }
  0x11   : > { %118 = sbr.rel (%p115_p10) target bundleno = 44 (0x2c), region = 24  ;;  %s132_s26 = sand.u32 (!%p115_p10), 1, %s380_s12  }
  0x12   : > { %s254_s30 = sshll.u32 (!%p115_p10), %s132_s26, 3  ;;  %s259_s3 = sshll.u32 (!%p115_p10), %s388_s14, 3 }
  0x13   : > { %s180_s6 = scalar_lea.hbm (!%p115_p10), %s517_s2, %s259_s3  ;;  %s134_s7 = scalar_lea.vmem (!%p115_p10), [#allocation5], %s254_s30 }
  0x14   : > { %s182_s8 = sshll.u32 (!%p115_p10), %s134_s7, 4  ;;  %s184_s9 = sshll.u32 (!%p115_p10), %s180_s6, 4  ;;  %s183_s8 = int_to_ptr.vmem [resolvable:$true] %s182_s8  ;;  %s185_s9 = int_to_ptr.hbm [resolvable:$true] %s184_s9 }
  0x15   : > { %s170_s10 = scalar_lea.sflag (!%p115_p10), [#allocation6], %s132_s26  ;;  %s332_s0 = sshra.s32 (!%p115_p10), %s185_s9, 4  ;;  %s333_s0 = int_to_ptr.hbm [resolvable:$true] %s332_s0 }
  0x16   : > { %v150_v0 = vlaneseq  ;;  %v398_v1 = vmov 0.0   ;;  %v152_v2 = vstv %s388_s14  ;;  %s137_s25 = scalar_select %p136_p11, %s388_s14, 0  ;;  %v155_v5 = vstv %s154_s24 }
  0x17   : > { %148 = vst [vmem:[#allocation2] sm:$0xff] %v398_v1  ;;  %s334_s17 = scalar_lea.hbm %s333_s0, 8  ;;  %s338_s21 = scalar_lea.hbm %s517_s2, 16 }
  0x18   : > { %v151_v3 = vshrl.u32 %v150_v0, 7  ;;  %s528_s25 = smov (!%p136_p11, %s137_s25), 0  ;;  %p335_p12 = scmp.ne.s32.totalorder %s333_s0, %s334_s17 }
  0x19   : > { %s140_s29 = scalar_lea.vmem %s516_s1, %s528_s25  ;;  %p339_p1 = scmp.lt.s32.totalorder %s333_s0, %s517_s2 }
  0x1a   : > { %v153_v4 = vadd.s32 %v152_v2, %v151_v3  ;;  %v157_v6 = vld [vmem:[%s140_s29] sm:$0x1]  ;;  %p336_p13 = pnand %p335_p12, %p457_p4  ;;  %p340_p2 = scmp.lt.s32.totalorder %s338_s21, %s334_s17 }
  0x1c   : > { %vm156_vm0 = vcmp.lt.s32.totalorder %v153_v4, %v155_v5  ;;  %p337_p0 = pneg %p336_p13  ;;  %p341_p3 = por %p340_p2, %p339_p1 }
  0x1d   : > { %v160_v7 = vsel %vm156_vm0, %v157_v6, 0.0 }
  0x1e   : > { %v161_v8 = vld [vmem:[#allocation2] sm:$0x1]  ;;  %p342_p5 = pnand %p341_p3, %p337_p0 }
  0x1f   : > { %v162_v9 = vadd.f32 %v161_v8, %v160_v7 }
  0x21   : > { %163 = vst [vmem:[#allocation2] sm:$0x1] %v162_v9 }
  0x28   : > { %v167_v10 = vld [vmem:[#allocation2] sm:$0xff] }
  0x29   : > { %168 = vst [vmem:[%s134_s7] sm:$0xff] %v167_v10 }
  0x2a   : > { %345 = shalt.err (!%p342_p5)
}
  0x2b   : > { %262 = dma.vmem_to_hbm [thread:$0]  (%p457_p4), %s183_s8, 128, %s185_s9, %s170_s10  }
  0x2c PF: > { %p268_p6 = scmp.ge.s32.totalorder %s396_s16, 2  ;;  %s196_s26 = sand.u32 1, %s376_s11  }
  0x2d   : > { %s197_s27 = scalar_lea.sflag [#allocation6], %s196_s26 }
  0x2e   : > { %p265_p7 = pnand %p268_p6, %p464_p8 }
  0x30   : > { %p266_p9 = pneg %p265_p7 }
  0x32   : > { %371 = dma.done.wait (%p266_p9), %s197_s27, 128  }
  0x33   : > { %373 = vsyncadd (%p266_p9), %s197_s27, 4294967168  ;;  %s16_s16 = sadd.s32 1, %s396_s16   ;;  %s520_s11 = smov %s380_s12 }
  0x34   : > { %p13_p10 = scmp.ge.s32.totalorder %s16_s16, 4   ;;  %s521_s12 = smov %s384_s13 }
  0x35   : > { %s522_s13 = smov %s470_s23  ;;  %s523_s14 = smov %s392_s15 }
  0x36   : > { %s524_s15 = smov %s526_s18  ;;  %15 = sbr.rel (!%p13_p10) target bundleno = 6 (0x6), region = 67 }
  0x3b   :  { %203 = vsyncpa [#allocation6], 1 }
  0x3c   :  { %205 = vsyncpa [#allocation6 + $0x1], 1 }

</bundles_post_ra>
